<compile_context>
chip_gen: v7x
topology: tpu7x:2x2x1
jax: 0.10.0
libtpu: 0.0.40
codegen_flags: <defaults>
</compile_context>

<pallas_src>
from functools import partial

import jax
import jax.numpy as jnp
from jax.experimental import pallas as pl
from jax.experimental.pallas import tpu as pltpu

NEG_SLOPE = 0.2
LN_EPS = 1e-5


def _leaky_relu(v):
    return jnp.where(v > 0, v, NEG_SLOPE * v)


def _round_up(n, m):
    return ((n + m - 1) // m) * m


def _hvn_kernel(
    x_ref,                      # (TILE_B, D_in)
    w0_ref, b0_ref,             # Linear(D_in -> H)
    w1_ref, b1_ref,             # SkipLayer(H).hidden
    w2_ref, b2_ref,             # SkipLayer(H).hidden
    ln_g_ref, ln_b_ref,         # LayerNorm(H)
    wl_ref, bl_ref,             # last_layer Linear(H -> H)
    wo_ref, bo_ref,             # out_layer row (1, H), bias (1, 1)
    out_ref,                    # (1, TILE_B)  -- lane-dense output
    *, compute_dtype,
):
    def dot(a, w_ref):
        return jnp.dot(a.astype(compute_dtype), w_ref[...],
                       preferred_element_type=jnp.float32)

    x = x_ref[...]

    # hidden layer 0: plain Linear (prev != units), then LeakyReLU
    h = _leaky_relu(dot(x, w0_ref) + b0_ref[...])

    # hidden layers 1/2: SkipLayer -> hidden(x) + x, then LeakyReLU
    h = _leaky_relu(dot(h, w1_ref) + b1_ref[...] + h)
    h = _leaky_relu(dot(h, w2_ref) + b2_ref[...] + h)

    # LayerNorm over the feature (lane) axis — single reduce pass.
    H = h.shape[-1]
    inv_h = 1.0 / H
    s = jnp.sum(h, axis=-1, keepdims=True)
    s2 = jnp.sum(h * h, axis=-1, keepdims=True)
    mu = s * inv_h
    var = s2 * inv_h - mu * mu
    h = (h - mu) * jax.lax.rsqrt(var + LN_EPS)
    h = h * ln_g_ref[...] + ln_b_ref[...]

    # last_layer Linear + LeakyReLU
    h = _leaky_relu(dot(h, wl_ref) + bl_ref[...])

    # out_layer: contract feature axis of (1,H) with (TILE_B,H) -> (1, TILE_B)
    # (lane-dense store instead of a masked (TILE_B, 1) column store).
    v = jax.lax.dot_general(
        wo_ref[...], h.astype(compute_dtype),
        dimension_numbers=(((1,), (1,)), ((), ())),
        preferred_element_type=jnp.float32)
    out_ref[...] = v + bo_ref[...]


def init_params(key, input_size, nodes_network_layers):
    """Deterministic synthetic parameters (transposed-Linear layout)."""
    H = nodes_network_layers[-1]
    ks = jax.random.split(key, 12)
    scale = 0.1
    return {
        "w0": scale * jax.random.normal(ks[0], (input_size, nodes_network_layers[0]), jnp.float32),
        "b0": scale * jax.random.normal(ks[1], (1, nodes_network_layers[0]), jnp.float32),
        "w1": scale * jax.random.normal(ks[2], (nodes_network_layers[0], nodes_network_layers[1]), jnp.float32),
        "b1": scale * jax.random.normal(ks[3], (1, nodes_network_layers[1]), jnp.float32),
        "w2": scale * jax.random.normal(ks[4], (nodes_network_layers[1], nodes_network_layers[2]), jnp.float32),
        "b2": scale * jax.random.normal(ks[5], (1, nodes_network_layers[2]), jnp.float32),
        "ln_g": jnp.ones((1, H), jnp.float32),
        "ln_b": jnp.zeros((1, H), jnp.float32),
        "wl": scale * jax.random.normal(ks[6], (H, H), jnp.float32),
        "bl": scale * jax.random.normal(ks[7], (1, H), jnp.float32),
        "wo": scale * jax.random.normal(ks[8], (1, H), jnp.float32),   # out_layer weight as a row
        "bo": scale * jax.random.normal(ks[9], (1, 1), jnp.float32),
    }


def history_value_network(inputs, params, *, compute_dtype=jnp.float32,
                          max_tile_b=512):
    x, mask = inputs            # mask unused, exactly like the PyTorch forward
    del mask
    B, D_in = x.shape

    # Batch tile: multiple of 8 sublanes; if multi-tile it is 512 (mult of 128)
    # so the lane-dense output block satisfies the (8,128) divisibility rule.
    tile_b = min(max_tile_b, _round_up(B, 8))
    b_pad = _round_up(B, tile_b)
    num_tiles = b_pad // tile_b
    if b_pad != B:
        x = jnp.pad(x, ((0, b_pad - B), (0, 0)))

    # Optional bf16 path (v6e/v7x): halves HBM bytes for x + matmul weights.
    if compute_dtype != jnp.float32:
        x = x.astype(compute_dtype)
        cast_w = lambda w: w.astype(compute_dtype)
    else:
        cast_w = lambda w: w

    operands = (
        x,
        cast_w(params["w0"]), params["b0"],
        cast_w(params["w1"]), params["b1"],
        cast_w(params["w2"]), params["b2"],
        params["ln_g"], params["ln_b"],
        cast_w(params["wl"]), params["bl"],
        cast_w(params["wo"]), params["bo"],
    )

    def resident_spec(a):
        # Full-array block, constant index_map -> DMA'd once, stays in VMEM.
        return pl.BlockSpec(a.shape, lambda i: (0,) * a.ndim)

    in_specs = [pl.BlockSpec((tile_b, D_in), lambda i: (i, 0))]
    in_specs += [resident_spec(a) for a in operands[1:]]
    out_spec = pl.BlockSpec((1, tile_b), lambda i: (0, i))

    # Advisory cost hint so XLA schedules around this cheap, mem-bound call.
    flops = 2 * b_pad * sum(int(operands[i].size) for i in (1, 3, 5, 9, 11))
    bytes_accessed = sum(int(a.size) * a.dtype.itemsize for a in operands) + b_pad * 4
    cost = pl.CostEstimate(flops=flops, transcendentals=b_pad,
                           bytes_accessed=bytes_accessed)

    out = pl.pallas_call(
        partial(_hvn_kernel, compute_dtype=compute_dtype),
        out_shape=jax.ShapeDtypeStruct((1, b_pad), jnp.float32),
        grid=(num_tiles,),
        in_specs=in_specs,
        out_specs=out_spec,
        compiler_params=pltpu.CompilerParams(
            dimension_semantics=("parallel",)),
        cost_estimate=cost,
    )(*operands)

    return out.reshape(b_pad, 1)[:B]


def _reference(inputs, params):
    """Pure-JAX reference mirroring the PyTorch forward."""
    x, _ = inputs
    lrelu = lambda v: jnp.where(v > 0, v, NEG_SLOPE * v)
    h = lrelu(x @ params["w0"] + params["b0"])
    h = lrelu(h @ params["w1"] + params["b1"] + h)
    h = lrelu(h @ params["w2"] + params["b2"] + h)
    mu = jnp.mean(h, axis=-1, keepdims=True)
    var = jnp.mean((h - mu) ** 2, axis=-1, keepdims=True)
    h = (h - mu) / jnp.sqrt(var + LN_EPS)
    h = h * params["ln_g"] + params["ln_b"]
    h = lrelu(h @ params["wl"] + params["bl"])
    return h @ params["wo"].T + params["bo"]


if __name__ == "__main__":
    input_size = 32
    nodes_network_layers = [64, 64, 64]
    batch = 8

    key = jax.random.PRNGKey(0)
    kx, km, kp = jax.random.split(key, 3)
    x = jax.random.normal(kx, (batch, input_size), jnp.float32)
    mask = (jax.random.uniform(km, (batch, input_size)) > 0.5).astype(jnp.float32)
    params = init_params(kp, input_size, nodes_network_layers)

    out = history_value_network((x, mask), params)
    out = jax.block_until_ready(out)

    ref = _reference((x, mask), params)
    assert out.shape == (batch, 1)
    assert jnp.allclose(out, ref, atol=1e-4, rtol=1e-4), "mismatch vs JAX reference"
    print("KERNEL_OK")
</pallas_src>

<mosaic_0001>
module attributes {stable_mosaic.version = 11 : i64} {
  func.func @_hvn_kernel(%arg0: i32, %arg1: memref<8x32xf32, #tpu.memory_space<vmem>>, %arg2: memref<32x64xf32, #tpu.memory_space<vmem>>, %arg3: memref<1x64xf32, #tpu.memory_space<vmem>>, %arg4: memref<64x64xf32, #tpu.memory_space<vmem>>, %arg5: memref<1x64xf32, #tpu.memory_space<vmem>>, %arg6: memref<64x64xf32, #tpu.memory_space<vmem>>, %arg7: memref<1x64xf32, #tpu.memory_space<vmem>>, %arg8: memref<1x64xf32, #tpu.memory_space<vmem>>, %arg9: memref<1x64xf32, #tpu.memory_space<vmem>>, %arg10: memref<64x64xf32, #tpu.memory_space<vmem>>, %arg11: memref<1x64xf32, #tpu.memory_space<vmem>>, %arg12: memref<1x64xf32, #tpu.memory_space<vmem>>, %arg13: memref<1x1xf32, #tpu.memory_space<vmem>>, %arg14: memref<1x8xf32, #tpu.memory_space<vmem>>) attributes {dimension_semantics = [#tpu.dimension_semantics<parallel>], iteration_bounds = array<i64: 1>, scalar_prefetch = 0 : i64, scratch_operands = 0 : i64, tpu.core_type = #tpu.core_type<tc>, window_params = [{transform_indices = @transform_0, window_bounds = array<i64: 8, 32>}, {pipeline_mode = #tpu.pipeline_mode<synchronous>, transform_indices = @transform_1, window_bounds = array<i64: 32, 64>}, {pipeline_mode = #tpu.pipeline_mode<synchronous>, transform_indices = @transform_2, window_bounds = array<i64: 1, 64>}, {pipeline_mode = #tpu.pipeline_mode<synchronous>, transform_indices = @transform_3, window_bounds = array<i64: 64, 64>}, {pipeline_mode = #tpu.pipeline_mode<synchronous>, transform_indices = @transform_4, window_bounds = array<i64: 1, 64>}, {pipeline_mode = #tpu.pipeline_mode<synchronous>, transform_indices = @transform_5, window_bounds = array<i64: 64, 64>}, {pipeline_mode = #tpu.pipeline_mode<synchronous>, transform_indices = @transform_6, window_bounds = array<i64: 1, 64>}, {pipeline_mode = #tpu.pipeline_mode<synchronous>, transform_indices = @transform_7, window_bounds = array<i64: 1, 64>}, {pipeline_mode = #tpu.pipeline_mode<synchronous>, transform_indices = @transform_8, window_bounds = array<i64: 1, 64>}, {pipeline_mode = #tpu.pipeline_mode<synchronous>, transform_indices = @transform_9, window_bounds = array<i64: 64, 64>}, {pipeline_mode = #tpu.pipeline_mode<synchronous>, transform_indices = @transform_10, window_bounds = array<i64: 1, 64>}, {pipeline_mode = #tpu.pipeline_mode<synchronous>, transform_indices = @transform_11, window_bounds = array<i64: 1, 64>}, {pipeline_mode = #tpu.pipeline_mode<synchronous>, transform_indices = @transform_12, window_bounds = array<i64: 1, 1>}, {transform_indices = @transform_13, window_bounds = array<i64: 1, 8>}]} {
    %c0 = arith.constant 0 : index
    %c0_0 = arith.constant 0 : index
    %0 = vector.load %arg1[%c0, %c0_0] : memref<8x32xf32, #tpu.memory_space<vmem>>, vector<8x32xf32>
    %c0_1 = arith.constant 0 : index
    %c0_2 = arith.constant 0 : index
    %1 = vector.load %arg2[%c0_1, %c0_2] : memref<32x64xf32, #tpu.memory_space<vmem>>, vector<32x64xf32>
    %cst = arith.constant dense<0.000000e+00> : vector<8x64xf32>
    %2 = tpu.matmul %0, %1, %cst {dimension_numbers = #tpu.dot_dimension_numbers<[1], [0], [0], [1], [0, 0, 1, 1], [], []>} : vector<8x32xf32>, vector<32x64xf32>, vector<8x64xf32> -> vector<8x64xf32>
    %c0_3 = arith.constant 0 : index
    %c0_4 = arith.constant 0 : index
    %3 = vector.load %arg3[%c0_3, %c0_4] : memref<1x64xf32, #tpu.memory_space<vmem>>, vector<1x64xf32>
    %4 = vector.broadcast %3 : vector<1x64xf32> to vector<8x64xf32>
    %5 = arith.addf %2, %4 : vector<8x64xf32>
    %cst_5 = arith.constant 0.000000e+00 : f32
    %6 = vector.broadcast %cst_5 : f32 to vector<8x64xf32>
    %7 = arith.cmpf ogt, %5, %6 : vector<8x64xf32>
    %cst_6 = arith.constant 2.000000e-01 : f32
    %8 = vector.broadcast %cst_6 : f32 to vector<8x64xf32>
    %9 = arith.mulf %8, %5 : vector<8x64xf32>
    %10 = arith.select %7, %5, %9 : vector<8x64xi1>, vector<8x64xf32>
    %c0_7 = arith.constant 0 : index
    %c0_8 = arith.constant 0 : index
    %11 = vector.load %arg4[%c0_7, %c0_8] : memref<64x64xf32, #tpu.memory_space<vmem>>, vector<64x64xf32>
    %cst_9 = arith.constant dense<0.000000e+00> : vector<8x64xf32>
    %12 = tpu.matmul %10, %11, %cst_9 {dimension_numbers = #tpu.dot_dimension_numbers<[1], [0], [0], [1], [0, 0, 1, 1], [], []>} : vector<8x64xf32>, vector<64x64xf32>, vector<8x64xf32> -> vector<8x64xf32>
    %c0_10 = arith.constant 0 : index
    %c0_11 = arith.constant 0 : index
    %13 = vector.load %arg5[%c0_10, %c0_11] : memref<1x64xf32, #tpu.memory_space<vmem>>, vector<1x64xf32>
    %14 = vector.broadcast %13 : vector<1x64xf32> to vector<8x64xf32>
    %15 = arith.addf %12, %14 : vector<8x64xf32>
    %16 = arith.addf %15, %10 : vector<8x64xf32>
    %cst_12 = arith.constant 0.000000e+00 : f32
    %17 = vector.broadcast %cst_12 : f32 to vector<8x64xf32>
    %18 = arith.cmpf ogt, %16, %17 : vector<8x64xf32>
    %cst_13 = arith.constant 2.000000e-01 : f32
    %19 = vector.broadcast %cst_13 : f32 to vector<8x64xf32>
    %20 = arith.mulf %19, %16 : vector<8x64xf32>
    %21 = arith.select %18, %16, %20 : vector<8x64xi1>, vector<8x64xf32>
    %c0_14 = arith.constant 0 : index
    %c0_15 = arith.constant 0 : index
    %22 = vector.load %arg6[%c0_14, %c0_15] : memref<64x64xf32, #tpu.memory_space<vmem>>, vector<64x64xf32>
    %cst_16 = arith.constant dense<0.000000e+00> : vector<8x64xf32>
    %23 = tpu.matmul %21, %22, %cst_16 {dimension_numbers = #tpu.dot_dimension_numbers<[1], [0], [0], [1], [0, 0, 1, 1], [], []>} : vector<8x64xf32>, vector<64x64xf32>, vector<8x64xf32> -> vector<8x64xf32>
    %c0_17 = arith.constant 0 : index
    %c0_18 = arith.constant 0 : index
    %24 = vector.load %arg7[%c0_17, %c0_18] : memref<1x64xf32, #tpu.memory_space<vmem>>, vector<1x64xf32>
    %25 = vector.broadcast %24 : vector<1x64xf32> to vector<8x64xf32>
    %26 = arith.addf %23, %25 : vector<8x64xf32>
    %27 = arith.addf %26, %21 : vector<8x64xf32>
    %cst_19 = arith.constant 0.000000e+00 : f32
    %28 = vector.broadcast %cst_19 : f32 to vector<8x64xf32>
    %29 = arith.cmpf ogt, %27, %28 : vector<8x64xf32>
    %cst_20 = arith.constant 2.000000e-01 : f32
    %30 = vector.broadcast %cst_20 : f32 to vector<8x64xf32>
    %31 = arith.mulf %30, %27 : vector<8x64xf32>
    %32 = arith.select %29, %27, %31 : vector<8x64xi1>, vector<8x64xf32>
    %cst_21 = arith.constant dense<0.000000e+00> : vector<8xf32>
    %33 = vector.multi_reduction <add>, %32, %cst_21 [1] : vector<8x64xf32> to vector<8xf32>
    %34 = vector.shape_cast %33 : vector<8xf32> to vector<8x1xf32>
    %35 = arith.mulf %32, %32 : vector<8x64xf32>
    %cst_22 = arith.constant dense<0.000000e+00> : vector<8xf32>
    %36 = vector.multi_reduction <add>, %35, %cst_22 [1] : vector<8x64xf32> to vector<8xf32>
    %37 = vector.shape_cast %36 : vector<8xf32> to vector<8x1xf32>
    %cst_23 = arith.constant 1.562500e-02 : f32
    %38 = vector.broadcast %cst_23 : f32 to vector<8x1xf32>
    %39 = arith.mulf %34, %38 : vector<8x1xf32>
    %cst_24 = arith.constant 1.562500e-02 : f32
    %40 = vector.broadcast %cst_24 : f32 to vector<8x1xf32>
    %41 = arith.mulf %37, %40 : vector<8x1xf32>
    %42 = arith.mulf %39, %39 : vector<8x1xf32>
    %43 = arith.subf %41, %42 : vector<8x1xf32>
    %44 = vector.broadcast %39 : vector<8x1xf32> to vector<8x64xf32>
    %45 = arith.subf %32, %44 : vector<8x64xf32>
    %cst_25 = arith.constant 9.99999974E-6 : f32
    %46 = vector.broadcast %cst_25 : f32 to vector<8x1xf32>
    %47 = arith.addf %43, %46 : vector<8x1xf32>
    %48 = math.rsqrt %47 : vector<8x1xf32>
    %49 = vector.broadcast %48 : vector<8x1xf32> to vector<8x64xf32>
    %50 = arith.mulf %45, %49 : vector<8x64xf32>
    %c0_26 = arith.constant 0 : index
    %c0_27 = arith.constant 0 : index
    %51 = vector.load %arg8[%c0_26, %c0_27] : memref<1x64xf32, #tpu.memory_space<vmem>>, vector<1x64xf32>
    %52 = vector.broadcast %51 : vector<1x64xf32> to vector<8x64xf32>
    %53 = arith.mulf %50, %52 : vector<8x64xf32>
    %c0_28 = arith.constant 0 : index
    %c0_29 = arith.constant 0 : index
    %54 = vector.load %arg9[%c0_28, %c0_29] : memref<1x64xf32, #tpu.memory_space<vmem>>, vector<1x64xf32>
    %55 = vector.broadcast %54 : vector<1x64xf32> to vector<8x64xf32>
    %56 = arith.addf %53, %55 : vector<8x64xf32>
    %c0_30 = arith.constant 0 : index
    %c0_31 = arith.constant 0 : index
    %57 = vector.load %arg10[%c0_30, %c0_31] : memref<64x64xf32, #tpu.memory_space<vmem>>, vector<64x64xf32>
    %cst_32 = arith.constant dense<0.000000e+00> : vector<8x64xf32>
    %58 = tpu.matmul %56, %57, %cst_32 {dimension_numbers = #tpu.dot_dimension_numbers<[1], [0], [0], [1], [0, 0, 1, 1], [], []>} : vector<8x64xf32>, vector<64x64xf32>, vector<8x64xf32> -> vector<8x64xf32>
    %c0_33 = arith.constant 0 : index
    %c0_34 = arith.constant 0 : index
    %59 = vector.load %arg11[%c0_33, %c0_34] : memref<1x64xf32, #tpu.memory_space<vmem>>, vector<1x64xf32>
    %60 = vector.broadcast %59 : vector<1x64xf32> to vector<8x64xf32>
    %61 = arith.addf %58, %60 : vector<8x64xf32>
    %cst_35 = arith.constant 0.000000e+00 : f32
    %62 = vector.broadcast %cst_35 : f32 to vector<8x64xf32>
    %63 = arith.cmpf ogt, %61, %62 : vector<8x64xf32>
    %cst_36 = arith.constant 2.000000e-01 : f32
    %64 = vector.broadcast %cst_36 : f32 to vector<8x64xf32>
    %65 = arith.mulf %64, %61 : vector<8x64xf32>
    %66 = arith.select %63, %61, %65 : vector<8x64xi1>, vector<8x64xf32>
    %c0_37 = arith.constant 0 : index
    %c0_38 = arith.constant 0 : index
    %67 = vector.load %arg12[%c0_37, %c0_38] : memref<1x64xf32, #tpu.memory_space<vmem>>, vector<1x64xf32>
    %cst_39 = arith.constant dense<0.000000e+00> : vector<1x8xf32>
    %68 = tpu.matmul %67, %66, %cst_39 {dimension_numbers = #tpu.dot_dimension_numbers<[1], [1], [0], [0], [0, 0, 1, 0], [], []>} : vector<1x64xf32>, vector<8x64xf32>, vector<1x8xf32> -> vector<1x8xf32>
    %c0_40 = arith.constant 0 : index
    %c0_41 = arith.constant 0 : index
    %69 = vector.load %arg13[%c0_40, %c0_41] : memref<1x1xf32, #tpu.memory_space<vmem>>, vector<1x1xf32>
    %70 = vector.broadcast %69 : vector<1x1xf32> to vector<1x8xf32>
    %71 = arith.addf %68, %70 : vector<1x8xf32>
    %c0_42 = arith.constant 0 : index
    %c0_43 = arith.constant 0 : index
    %72 = vector.load %arg14[%c0_42, %c0_43] : memref<1x8xf32, #tpu.memory_space<vmem>>, vector<1x8xf32>
    tpu.vector_store %arg14[%c0_42, %c0_43], %71 {strides = array<i32>} : memref<1x8xf32, #tpu.memory_space<vmem>>, vector<1x8xf32>,
    return
  }
  func.func @transform_0(%arg0: i32) -> (i32, i32) {
    %c0_i32 = arith.constant 0 : i32
    %c0_i32_0 = arith.constant 0 : i32
    return %arg0, %c0_i32 : i32, i32
  }
  func.func @transform_1(%arg0: i32) -> (i32, i32) {
    %c0_i32 = arith.constant 0 : i32
    %c0_i32_0 = arith.constant 0 : i32
    %c0_i32_1 = arith.constant 0 : i32
    return %c0_i32, %c0_i32_0 : i32, i32
  }
  func.func @transform_2(%arg0: i32) -> (i32, i32) {
    %c0_i32 = arith.constant 0 : i32
    %c0_i32_0 = arith.constant 0 : i32
    %c0_i32_1 = arith.constant 0 : i32
    return %c0_i32, %c0_i32_0 : i32, i32
  }
  func.func @transform_3(%arg0: i32) -> (i32, i32) {
    %c0_i32 = arith.constant 0 : i32
    %c0_i32_0 = arith.constant 0 : i32
    %c0_i32_1 = arith.constant 0 : i32
    return %c0_i32, %c0_i32_0 : i32, i32
  }
  func.func @transform_4(%arg0: i32) -> (i32, i32) {
    %c0_i32 = arith.constant 0 : i32
    %c0_i32_0 = arith.constant 0 : i32
    %c0_i32_1 = arith.constant 0 : i32
    return %c0_i32, %c0_i32_0 : i32, i32
  }
  func.func @transform_5(%arg0: i32) -> (i32, i32) {
    %c0_i32 = arith.constant 0 : i32
    %c0_i32_0 = arith.constant 0 : i32
    %c0_i32_1 = arith.constant 0 : i32
    return %c0_i32, %c0_i32_0 : i32, i32
  }
  func.func @transform_6(%arg0: i32) -> (i32, i32) {
    %c0_i32 = arith.constant 0 : i32
    %c0_i32_0 = arith.constant 0 : i32
    %c0_i32_1 = arith.constant 0 : i32
    return %c0_i32, %c0_i32_0 : i32, i32
  }
  func.func @transform_7(%arg0: i32) -> (i32, i32) {
    %c0_i32 = arith.constant 0 : i32
    %c0_i32_0 = arith.constant 0 : i32
    %c0_i32_1 = arith.constant 0 : i32
    return %c0_i32, %c0_i32_0 : i32, i32
  }
  func.func @transform_8(%arg0: i32) -> (i32, i32) {
    %c0_i32 = arith.constant 0 : i32
    %c0_i32_0 = arith.constant 0 : i32
    %c0_i32_1 = arith.constant 0 : i32
    return %c0_i32, %c0_i32_0 : i32, i32
  }
  func.func @transform_9(%arg0: i32) -> (i32, i32) {
    %c0_i32 = arith.constant 0 : i32
    %c0_i32_0 = arith.constant 0 : i32
    %c0_i32_1 = arith.constant 0 : i32
    return %c0_i32, %c0_i32_0 : i32, i32
  }
  func.func @transform_10(%arg0: i32) -> (i32, i32) {
    %c0_i32 = arith.constant 0 : i32
    %c0_i32_0 = arith.constant 0 : i32
    %c0_i32_1 = arith.constant 0 : i32
    return %c0_i32, %c0_i32_0 : i32, i32
  }
  func.func @transform_11(%arg0: i32) -> (i32, i32) {
    %c0_i32 = arith.constant 0 : i32
    %c0_i32_0 = arith.constant 0 : i32
    %c0_i32_1 = arith.constant 0 : i32
    return %c0_i32, %c0_i32_0 : i32, i32
  }
  func.func @transform_12(%arg0: i32) -> (i32, i32) {
    %c0_i32 = arith.constant 0 : i32
    %c0_i32_0 = arith.constant 0 : i32
    %c0_i32_1 = arith.constant 0 : i32
    return %c0_i32, %c0_i32_0 : i32, i32
  }
  func.func @transform_13(%arg0: i32) -> (i32, i32) {
    %c0_i32 = arith.constant 0 : i32
    %c0_i32_0 = arith.constant 0 : i32
    return %c0_i32, %arg0 : i32, i32
  }
}

</mosaic_0001>

<bundles_post_ra>
// kernel: tpu_custom_call.1
= control target key start
LH: loop header
LB: loop body
LE: loop exit
PB: predicated region body
PF: predicated region fallthrough
CT: control target
= control target key end

     0   :  { %s1154_s0 = inlined_call_operand.hbm [shape: f32[8,32], index: 0, kind: input, shape index: {}]   ;;  %s1155_s1 = inlined_call_operand.hbm [shape: f32[32,64], index: 1, kind: input, shape index: {}]   ;;  %s1156_s2 = inlined_call_operand.vmem [shape: f32[1,64], index: 2, kind: input, shape index: {}]   ;;  %s1157_s3 = inlined_call_operand.hbm [shape: f32[64,64], index: 3, kind: input, shape index: {}]   ;;  %s1158_s4 = inlined_call_operand.vmem [shape: f32[1,64], index: 4, kind: input, shape index: {}]   ;;  %s1159_s5 = inlined_call_operand.hbm [shape: f32[64,64], index: 5, kind: input, shape index: {}]   ;;  %s1160_s6 = inlined_call_operand.vmem [shape: f32[1,64], index: 6, kind: input, shape index: {}]   ;;  %s1161_s7 = inlined_call_operand.vmem [shape: f32[1,64], index: 7, kind: input, shape index: {}]   ;;  %s1162_s8 = inlined_call_operand.vmem [shape: f32[1,64], index: 8, kind: input, shape index: {}]   ;;  %s1163_s9 = inlined_call_operand.hbm [shape: f32[64,64], index: 9, kind: input, shape index: {}]   ;;  %s1164_s10 = inlined_call_operand.vmem [shape: f32[1,64], index: 10, kind: input, shape index: {}]   ;;  %s1165_s11 = inlined_call_operand.vmem [shape: f32[1,64], index: 11, kind: input, shape index: {}]   ;;  %s1166_s12 = inlined_call_operand.<no memory space> [shape: f32[1,1], index: 12, kind: input, shape index: {}]   ;;  %s1167_s13 = inlined_call_operand.hbm [shape: f32[1,8], index: 13, kind: output, shape index: {}]  }
   0x1   :  { %v18_v0 = vstv %s1166_s12 }
   0x2   :  { %19 = vst [vmem:[#allocation2] sm:$0x1] %v18_v0 }
   0x3   :  { %20 = vsyncpa [#allocation4], 0 }
   0x4   :  { %21 = vsyncpa [#allocation7], 0 }
   0x5   :  { %22 = vsyncpa [#allocation10], 0 }
   0x6   :  { %23 = vsyncpa [#allocation5], 0  ;;  %s932_s27 = smov [#allocation6]   ;;  %s792_s14 = scalar_lea.hbm %s1155_s1, 512 }
   0x7   :  { %s39_s28 = sshll.u32 %s932_s27, 4  ;;  %p793_p0 = scmp.ne.s32.totalorder %s1155_s1, %s792_s14  ;;  %s40_s28 = int_to_ptr.vmem [resolvable:$true] %s39_s28 }
   0x8   :  { %p796_p1 = scmp.lt.u32.totalorder %s792_s14, %s1155_s1 }
   0xa   :  { %p798_p2 = pnand %p796_p1, %p793_p0 }
   0xc   :  { %801 = shalt.err (!%p798_p2)
}
   0xd   :  { %s802_s12 = scalar_lea.vmem %s40_s28, 512  ;;  %p807_p4 = scmp.lt.s32.totalorder %s40_s28, %s40_s28 }
   0xe   :  { %p803_p3 = scmp.ne.s32.totalorder %s40_s28, %s802_s12  ;;  %p808_p5 = scmp.lt.s32.totalorder %s802_s12, %s802_s12 }
  0x10   :  { %p809_p6 = por %p808_p5, %p807_p4 }
  0x12   :  { %p810_p7 = pnand %p809_p6, %p803_p3 }
  0x14   :  { %813 = shalt.err (!%p810_p7)
}
  0x15   :  { %s933_s19 = smov 128   ;;  %s934_s20 = smov 8  }
  0x16   :  { %45 = dma.hbm_to_vmem [thread:$0]  %s1155_s1, 512, %s40_s28, [#allocation7], %s933_s19, %s933_s19, %s934_s20  }
  0x17   :  { %s935_s23 = smov [#allocation9]   ;;  %s936_s25 = smov [#allocation3]  }
  0x18   :  { %s67_s24 = sshll.u32 %s935_s23, 4  ;;  %s30_s26 = sshll.u32 %s936_s25, 4  ;;  %s68_s24 = int_to_ptr.vmem [resolvable:$true] %s67_s24  ;;  %s31_s26 = int_to_ptr.vmem [resolvable:$true] %s30_s26 }
  0x19   :  { %s814_s30 = scalar_lea.hbm %s1159_s5, 1024 }
  0x1a   :  { %p815_p8 = scmp.ne.s32.totalorder %s1159_s5, %s814_s30  ;;  %p818_p9 = scmp.lt.u32.totalorder %s814_s30, %s1159_s5 }
  0x1c   :  { %p820_p10 = pnand %p818_p9, %p815_p8 }
  0x1e   :  { %823 = shalt.err (!%p820_p10)
}
  0x1f   :  { %s824_s1 = scalar_lea.vmem %s68_s24, 1024  ;;  %p829_p12 = scmp.lt.s32.totalorder %s68_s24, %s68_s24 }
  0x20   :  { %p825_p11 = scmp.ne.s32.totalorder %s68_s24, %s824_s1  ;;  %p830_p13 = scmp.lt.s32.totalorder %s824_s1, %s824_s1 }
  0x22   :  { %p831_p0 = por %p830_p13, %p829_p12 }
  0x24   :  { %p832_p1 = pnand %p831_p0, %p825_p11 }
  0x26   :  { %835 = shalt.err (!%p832_p1)
}
  0x27   :  { %73 = dma.hbm_to_vmem [thread:$0]  %s1159_s5, 1024, %s68_s24, [#allocation10], %s933_s19, %s933_s19, %s934_s20  }
  0x28   :  { %s836_s22 = scalar_lea.hbm %s1154_s0, 128 }
  0x29   :  { %p837_p2 = scmp.ne.s32.totalorder %s1154_s0, %s836_s22  ;;  %p840_p3 = scmp.lt.u32.totalorder %s836_s22, %s1154_s0 }
  0x2b   :  { %p842_p4 = pnand %p840_p3, %p837_p2 }
  0x2d   :  { %845 = shalt.err (!%p842_p4)
}
  0x2e   :  { %s846_s30 = scalar_lea.vmem %s31_s26, 128  ;;  %p851_p6 = scmp.lt.s32.totalorder %s31_s26, %s31_s26 }
  0x2f   :  { %p847_p5 = scmp.ne.s32.totalorder %s31_s26, %s846_s30  ;;  %p852_p7 = scmp.lt.s32.totalorder %s846_s30, %s846_s30 }
  0x31   :  { %p853_p8 = por %p852_p7, %p851_p6 }
  0x33   :  { %p854_p9 = pnand %p853_p8, %p847_p5 }
  0x35   :  { %857 = shalt.err (!%p854_p9)
}
  0x36   :  { %33 = dma.hbm_to_vmem [thread:$0]  %s1154_s0, 128, %s31_s26, [#allocation4]  }
  0x37   :  { %s937_s14 = smov [#allocation8]   ;;  %s938_s16 = smov [#allocation11]  }
  0x38   :  { %s53_s15 = sshll.u32 %s937_s14, 4  ;;  %s85_s17 = sshll.u32 %s938_s16, 4  ;;  %s54_s15 = int_to_ptr.vmem [resolvable:$true] %s53_s15  ;;  %s86_s17 = int_to_ptr.vmem [resolvable:$true] %s85_s17 }
  0x39   :  { %s858_s18 = scalar_lea.hbm %s1157_s3, 1024 }
  0x3a   :  { %p859_p10 = scmp.ne.s32.totalorder %s1157_s3, %s858_s18  ;;  %p862_p11 = scmp.lt.u32.totalorder %s858_s18, %s1157_s3 }
  0x3c   :  { %p864_p12 = pnand %p862_p11, %p859_p10 }
  0x3e   :  { %867 = shalt.err (!%p864_p12)
}
  0x3f   :  { %s868_s0 = scalar_lea.vmem %s54_s15, 1024  ;;  %p873_p0 = scmp.lt.s32.totalorder %s54_s15, %s54_s15 }
  0x40   :  { %p869_p13 = scmp.ne.s32.totalorder %s54_s15, %s868_s0  ;;  %p874_p1 = scmp.lt.s32.totalorder %s868_s0, %s868_s0 }
  0x42   :  { %p875_p2 = por %p874_p1, %p873_p0 }
  0x44   :  { %p876_p3 = pnand %p875_p2, %p869_p13 }
  0x46   :  { %879 = shalt.err (!%p876_p3)
}
  0x47   :  { %59 = dma.hbm_to_vmem [thread:$0]  %s1157_s3, 1024, %s54_s15, [#allocation7], %s933_s19, %s933_s19, %s934_s20  }
  0x48   :  { %s880_s30 = scalar_lea.hbm %s1163_s9, 1024 }
  0x49   :  { %p881_p4 = scmp.ne.s32.totalorder %s1163_s9, %s880_s30  ;;  %p884_p5 = scmp.lt.u32.totalorder %s880_s30, %s1163_s9 }
  0x4b   :  { %p886_p6 = pnand %p884_p5, %p881_p4 }
  0x4d   :  { %889 = shalt.err (!%p886_p6)
}
  0x4e   :  { %s890_s1 = scalar_lea.vmem %s86_s17, 1024  ;;  %p895_p8 = scmp.lt.s32.totalorder %s86_s17, %s86_s17 }
  0x4f   :  { %p891_p7 = scmp.ne.s32.totalorder %s86_s17, %s890_s1  ;;  %p896_p9 = scmp.lt.s32.totalorder %s890_s1, %s890_s1 }
  0x51   :  { %p897_p10 = por %p896_p9, %p895_p8 }
  0x53   :  { %p898_p11 = pnand %p897_p10, %p891_p7 }
  0x55   :  { %901 = shalt.err (!%p898_p11)
}
  0x56   :  { %91 = dma.hbm_to_vmem [thread:$0]  %s1163_s9, 1024, %s86_s17, [#allocation10], %s933_s19, %s933_s19, %s934_s20  }
  0x57   :  { %924 = dma.done.wait [#allocation4], 128  }
  0x58   :  { %925 = vsyncadd [#allocation4], 4294967168 }
  0x59   :  { %926 = dma.done.wait [#allocation7], 1536  }
  0x5a   :  { %927 = vsyncadd [#allocation7], 4294965760 }
  0x5b   :  { %928 = dma.done.wait [#allocation10], 2048  }
  0x5c   :  { %929 = vsyncadd [#allocation10], 4294965248  ;;  %v939_v1 = vmov 0.0|0.0   ;;  %vm940_vm0 = vmmov 0   ;;  %v941_v2 = vmov 0.0   ;;  %v114_v3 = vld [vmem:[#allocation6] sm:$0xff] }
  0x5d   :  { %734 = vmatprep.subr.bf16.mxu0 %v939_v1  ;;  %669 = vmatprep.mubr.msk.f32.mxu0 %vm940_vm0, %v941_v2  ;;  %v115_v4 = vld [vmem:[#allocation6 + $0x8] sm:$0xff]  ;;  %v116_v5 = vld [vmem:[#allocation6 + $0x10] sm:$0xff]  ;;  %v117_v7 = vld [vmem:[#allocation6 + $0x18] sm:$0xff]  ;;  %vm125_vm1 = vcmask 261120   ;;  %vm217_vm3 = vcmask 523264   ;;  %vm596_vm7 = vcmask 57344  }
  0x5e   :  { %740 = vmatprep.subr.bf16.mxu1 %v939_v1  ;;  %688 = vmatprep.mubr.msk.f32.mxu1 %vm940_vm0, %v941_v2  ;;  %v735_v6 = vpack.c.bf16 %v115_v4, %v114_v3  ;;  %v202_v8 = vld [vmem:[#allocation8] sm:$0xff]  ;;  %v203_v9 = vld [vmem:[#allocation8 + $0x8] sm:$0xff]  ;;  %v204_v10 = vld [vmem:[#allocation8 + $0x10] sm:$0xff]  ;;  %v738_v12 = vpack.c.bf16 %v117_v7, %v116_v5 }
  0x5f   :  { %v205_v11 = vld [vmem:[#allocation8 + $0x18] sm:$0xff]  ;;  %v741_v13 = vpack.c.bf16 %v203_v9, %v202_v8  ;;  %v206_v15 = vld [vmem:[#allocation8 + $0x20] sm:$0xff]  ;;  %v207_v16 = vld [vmem:[#allocation8 + $0x28] sm:$0xff] }
  0x60   :  { %736 = vmatpush3.bf16.msra.mxu0 %v735_v6  ;;  %v744_v14 = vpack.c.bf16 %v205_v11, %v204_v10  ;;  %v113_v17 = vld [vmem:[#allocation3] sm:$0xff]  ;;  %v747_v18 = vpack.c.bf16 %v207_v16, %v206_v15  ;;  %v208_v19 = vld [vmem:[#allocation8 + $0x30] sm:$0xff]  ;;  %v295_v22 = vld [vmem:[#allocation9] sm:$0xff] }
  0x61   :  { %737 = vmatprep.subr.bf16.mxu0 %v939_v1  ;;  %742 = vmatpush3.bf16.msra.mxu1 %v741_v13  ;;  %v209_v20 = vld [vmem:[#allocation8 + $0x38] sm:$0xff]  ;;  %v296_v23 = vld [vmem:[#allocation9 + $0x8] sm:$0xff]  ;;  %v297_v24 = vld [vmem:[#allocation9 + $0x10] sm:$0xff] }
  0x62   :  { %743 = vmatprep.subr.bf16.mxu1 %v939_v1  ;;  %v750_v21 = vpack.c.bf16 %v209_v20, %v208_v19  ;;  %v753_v25 = vpack.c.bf16 %v296_v23, %v295_v22  ;;  %v298_v26 = vld [vmem:[#allocation9 + $0x18] sm:$0xff]  ;;  %v615_v28 = vld [vmem:[%s1156_s2] ss:$0 sm:$0xff]  ;;  %v299_v34 = vld [vmem:[#allocation9 + $0x20] sm:$0xff]  ;;  %v942_v20 = vmov 0  }
  0x63   :  { %v756_v27 = vpack.c.bf16 %v298_v26, %v297_v24  ;;  %v300_v35 = vld [vmem:[#allocation9 + $0x28] sm:$0xff]  ;;  %v301_v37 = vld [vmem:[#allocation9 + $0x30] sm:$0xff]  ;;  %v302_v38 = vld [vmem:[#allocation9 + $0x38] sm:$0xff]  ;;  %788 = vset.pattern.permute.xlu1 %v942_v20  ;;  %789 = vset.pattern.permute.xlu0 %v942_v20 }
  0x64   :  { %739 = vmatpush3.bf16.msra.mxu0 %v738_v12  ;;  %v759_v36 = vpack.c.bf16 %v300_v35, %v299_v34  ;;  %v762_v39 = vpack.c.bf16 %v302_v38, %v301_v37  ;;  %v617_v40 = vld [vmem:[%s1158_s4] ss:$0 sm:$0xff]  ;;  %v418_v57 = vld [vmem:[#allocation11] sm:$0xff]  ;;  %v419_v58 = vld [vmem:[#allocation11 + $0x8] sm:$0xff] }
  0x65   :  { %752 = vmatprep.subr.bf16.mxu0 %v939_v1  ;;  %745 = vmatpush3.bf16.msra.mxu1 %v744_v14  ;;  %v619_v47 = vld [vmem:[%s1160_s6] ss:$0 sm:$0xff]  ;;  %v765_v59 = vpack.c.bf16 %v419_v58, %v418_v57  ;;  %v421_v61 = vld [vmem:[#allocation11 + $0x18] sm:$0xff]  ;;  %v422_v63 = vld [vmem:[#allocation11 + $0x20] sm:$0xff] }
  0x66   :  { %746 = vmatprep.subr.bf16.mxu1 %v939_v1  ;;  %v420_v60 = vld [vmem:[#allocation11 + $0x10] sm:$0xff]  ;;  %v423_v0 = vld [vmem:[#allocation11 + $0x28] sm:$0xff]  ;;  %v425_v4 = vld [vmem:[#allocation11 + $0x38] sm:$0xff] }
  0x67   :  { %670 = vmatmul.mubr.msk.f32.vlgmr.msra.gmra.mrb[0].mxu0 %vm125_vm1, %v113_v17  ;;  %v768_v62 = vpack.c.bf16 %v421_v61, %v420_v60  ;;  %v424_v3 = vld [vmem:[#allocation11 + $0x30] sm:$0xff] }
  0x68   :  { %707 = vmatprep.mubr.msk.f32.mxu0 %vm940_vm0, %v941_v2  ;;  %754 = vmatpush3.bf16.msra.mxu0 %v753_v25  ;;  %v774_v5 = vpack.c.bf16 %v425_v4, %v424_v3  ;;  %v621_v15 = vld [vmem:[%s1161_s7] ss:$0 sm:$0xff] }
  0x69   :  { %748 = vmatpush3.bf16.msra.mxu1 %v747_v18  ;;  %755 = vmatprep.subr.bf16.mxu0 %v939_v1  ;;  %v510_v19 = vld [vmem:[#allocation2] sm:$0x1] }
  0x6a   :  { %749 = vmatprep.subr.bf16.mxu1 %v939_v1  ;;  %513 = vperm.xlu1 %788, %v510_v19  }
  0x6c   :  { %757 = vmatpush3.bf16.msra.mxu0 %v756_v27  ;;  %v509_v27 = vld [vmem:[%s1165_s11] sm:$0x1] }
  0x6d   :  { %751 = vmatpush3.bf16.msra.mxu1 %v750_v21  ;;  %758 = vmatprep.subr.bf16.mxu0 %v939_v1  ;;  %v623_v21 = vld [vmem:[%s1164_s10] ss:$0 sm:$0xff]  ;;  %s943_s10 = smov [#allocation12]  }
  0x6e   :  { %764 = vmatprep.subr.bf16.mxu1 %v939_v1  ;;  %s604_s23 = sshll.u32 %s943_s10, 4  ;;  %s605_s23 = int_to_ptr.vmem [resolvable:$true] %s604_s23 }
  0x6f   :  { %s902_s0 = scalar_lea.vmem %s605_s23, 16  ;;  %s906_s26 = scalar_lea.vmem %s605_s23, 32 }
  0x70   :  { %760 = vmatpush3.bf16.msra.mxu0 %v759_v36  ;;  %p903_p12 = scmp.ne.s32.totalorder %s605_s23, %s902_s0  ;;  %p907_p13 = scmp.lt.s32.totalorder %s605_s23, %s605_s23 }
  0x71   :  { %761 = vmatprep.subr.bf16.mxu0 %v939_v1  ;;  %p908_p0 = scmp.lt.s32.totalorder %s906_s26, %s902_s0 }
  0x73   :  { %p909_p1 = por %p908_p0, %p907_p13 }
  0x74   :  { %763 = vmatpush3.bf16.msra.mxu0 %v762_v39 }
  0x75   :  { %729 = vmatprep.subr.mxu0 %v941_v2  ;;  %p910_p2 = pnand %p909_p1, %p903_p12 }
 0x13a   :  { %v195_v29 = vpop.f32.mrb[0].mxu0 }
 0x13b   :  { %v196_v30 = vadd.f32 %v615_v28, %v195_v29  ;;  %v671_v31 = vpop.f32.mrb[1].mxu0  ;;  %v516_v28 = vlaneseq }
 0x13c   :  { %v514_v31 = vpop.permute.xlu1 %513 }
 0x13d   :  { %vm199_vm2 = vcmp.gt.f32.partialorder %v196_v30, 0.0  ;;  %v200_v32 = vmul.f32 0.2, %v196_v30  ;;  %v517_v29 = vshrl.u32 %v516_v28, 7 }
 0x13f   :  { %v201_v33 = vsel %vm199_vm2, %v196_v30, %v200_v32  ;;  %v518_v30 = vsub.s32 0, %v517_v29 }
 0x140   :  { %689 = vmatmul.mubr.msk.f32.vlgmr.msra.gmra.mrb[0].mxu1 %vm217_vm3, %v201_v33 }
 0x141   :  { %726 = vmatprep.mubr.msk.f32.mxu1 %vm940_vm0, %v941_v2  ;;  %766 = vmatpush3.bf16.msra.mxu1 %v765_v59  ;;  %v519_v32 = vrot.slane %v514_v31, %v518_v30 }
 0x142   :  { %767 = vmatprep.subr.bf16.mxu1 %v939_v1 }
 0x145   :  { %769 = vmatpush3.bf16.msra.mxu1 %v768_v62 }
 0x146   :  { %770 = vmatprep.subr.bf16.mxu1 %v939_v1 }
 0x213   :  { %v287_v41 = vpop.f32.mrb[0].mxu1 }
 0x214   :  { %v288_v42 = vadd.f32 %v617_v40, %v287_v41  ;;  %v690_v43 = vpop.f32.mrb[1].mxu1 }
 0x216   :  { %v291_v44 = vadd.f32 %v288_v42, %v201_v33 }
 0x218   :  { %vm292_vm4 = vcmp.gt.f32.partialorder %v291_v44, 0.0  ;;  %v293_v45 = vmul.f32 0.2, %v291_v44 }
 0x21a   :  { %v294_v46 = vsel %vm292_vm4, %v291_v44, %v293_v45 }
 0x21b   :  { %708 = vmatmul.mubr.msk.f32.vlgmr.msra.gmra.mrb[2].mxu0 %vm217_vm3, %v294_v46 }
 0x21c   :  { %731 = vmatprep.mubr.msk.f32.mxu0 %vm940_vm0, %v941_v2  ;;  %v771_v2 = vpack.c.bf16 %v423_v0, %v422_v63 }
 0x21e   :  { %772 = vmatpush3.bf16.msra.mxu1 %v771_v2 }
 0x21f   :  { %773 = vmatprep.subr.bf16.mxu1 %v939_v1  ;;  %v622_v1 = vld [vmem:[%s1162_s8] ss:$0 sm:$0xff] }
 0x222   :  { %775 = vmatpush3.bf16.msra.mxu1 %v774_v5 }
 0x2ee   :  { %v379_v48 = vpop.f32.mrb[2].mxu0 }
 0x2ef   :  { %v380_v49 = vadd.f32 %v619_v47, %v379_v48  ;;  %v709_v50 = vpop.f32.mrb[3].mxu0 }
 0x2f1   :  { %v383_v51 = vadd.f32 %v380_v49, %v294_v46 }
 0x2f3   :  { %vm384_vm5 = vcmp.gt.f32.partialorder %v383_v51, 0.0  ;;  %v385_v52 = vmul.f32 0.2, %v383_v51 }
 0x2f5   :  { %v386_v53 = vsel %vm384_vm5, %v383_v51, %v385_v52 }
 0x2f6   :  { %v387_v54 = vsel %vm217_vm3, %v386_v53, 0.0  ;;  %v390_v55 = vmul.f32 %v386_v53, %v386_v53 }
 0x2f7   :  { %388 = vadd.xlane.f32.xlu0 %v387_v54 }
 0x2f8   :  { %v391_v56 = vsel %vm217_vm3, %v390_v55, 0.0 }
 0x2fb   :  { %392 = vadd.xlane.f32.xlu0 %v391_v56 }
 0x384   :  { %v389_v6 = vpop.xlane.xlu0 %388 }
 0x385   :  { %v394_v7 = vmul.f32 0.015625, %v389_v6 }
 0x387   :  { %v396_v9 = vmul.f32 %v394_v7, %v394_v7  ;;  %v398_v13 = vsub.f32 %v386_v53, %v394_v7 }
 0x388   :  { %v393_v8 = vpop.xlane.xlu0 %392 }
 0x389   :  { %v395_v10 = vmul.f32 0.015625, %v393_v8 }
 0x38b   :  { %v397_v11 = vsub.f32 %v395_v10, %v396_v9 }
 0x38d   :  { %v399_v12 = vadd.f32 1e-05, %v397_v11 }
 0x38f   :  { %790 = vrsqrt.f32 %v399_v12 }
 0x399   :  { %v791_v14 = vpop.eup %790 }
 0x39a   :  { %v401_v16 = vmul.f32 %v791_v14, %v398_v13 }
 0x39c   :  { %v409_v17 = vmul.f32 %v621_v15, %v401_v16 }
 0x39e   :  { %v417_v18 = vadd.f32 %v622_v1, %v409_v17 }
 0x3a0   :  { %727 = vmatmul.mubr.msk.f32.vlgmr.msra.gmra.mrb[2].mxu1 %vm217_vm3, %v417_v18 }
 0x473   :  { %v502_v22 = vpop.f32.mrb[2].mxu1 }
 0x474   :  { %v503_v23 = vadd.f32 %v623_v21, %v502_v22  ;;  %v728_v24 = vpop.f32.mrb[3].mxu1 }
 0x476   :  { %vm506_vm6 = vcmp.gt.f32.partialorder %v503_v23, 0.0  ;;  %v507_v25 = vmul.f32 0.2, %v503_v23 }
 0x478   :  { %v508_v26 = vsel %vm506_vm6, %v503_v23, %v507_v25 }
 0x479   :  { %730 = vmatpush3.xpose.msk.msra.mxu0 %vm217_vm3, %v508_v26 }
 0x47c   :  { %732 = vmatmul.mubr.msk.f32.vlgmr.msra.gmra.mrb[4].mxu0 %vm217_vm3, %v509_v27 }
 0x54f   :  { %v592_v33 = vpop.f32.mrb[4].mxu0 }
 0x550   :  { %v593_v34 = vadd.f32 %v592_v33, %v519_v32  ;;  %v733_v35 = vpop.f32.mrb[5].mxu0 }
 0x552   :  { %597 = vst.msk [vmem:[#allocation12] sm:$0x1] %vm596_vm7, %v593_v34 }
 0x553   :  { %913 = shalt.err (!%p910_p2)
}
 0x554   :  { %s914_s27 = scalar_lea.hbm %s1167_s13, 16 }
 0x555   :  { %p915_p3 = scmp.ne.s32.totalorder %s1167_s13, %s914_s27  ;;  %p918_p4 = scmp.lt.u32.totalorder %s914_s27, %s1167_s13 }
 0x557   :  { %p920_p5 = pnand %p918_p4, %p915_p3 }
 0x559   :  { %923 = shalt.err (!%p920_p5)
}
 0x55a   :  { %607 = dma.vmem_to_hbm [thread:$0]  %s605_s23, 16, %s1167_s13, [#allocation5]  }
 0x55b   :  { %930 = dma.done.wait [#allocation5], 16  }
 0x55c   :  { %931 = vsyncadd [#allocation5], 4294967280 }
 0x55d   :  { %611 = vsyncpa [#allocation4], 1 }
 0x55e   :  { %612 = vsyncpa [#allocation7], 1 }
 0x55f   :  { %613 = vsyncpa [#allocation10], 1 }
 0x560   :  { %614 = vsyncpa [#allocation5], 1 }

</bundles_post_ra>
